<compile_context>
chip_gen: v7x
topology: tpu7x:2x2x1
jax: 0.10.0
libtpu: 0.0.40
codegen_flags: <defaults>
</compile_context>

<pallas_src>
import functools
import numpy as np

import jax
import jax.numpy as jnp
from jax import lax
from jax.experimental import pallas as pl
from jax.experimental.pallas import tpu as pltpu

_F32 = jnp.float32
_VMEM_LIMIT = 48 * 1024 * 1024      # < v7x 64 MiB physical, with headroom


# ----------------------------------------------------------------------------
# small helpers
# ----------------------------------------------------------------------------

def _round_up(x, m):
    return (x + m - 1) // m * m


def _pick_div(n, cands):
    for c in cands:
        if n % c == 0:
            return c
    return n


def _row_tiles(m, tmax=512):
    """Row (sublane) tiling for the elementwise / reduction kernels."""
    if m >= tmax:
        return _round_up(m, tmax), tmax
    mp = _round_up(m, 8)
    return mp, mp


def _pad_rows(a, mp):
    m = a.shape[0]
    if mp == m:
        return a
    return jnp.pad(a, ((0, mp - m),) + ((0, 0),) * (a.ndim - 1))


def _chan_tile(c):
    return 256 if (c >= 256 and c % 256 == 0) else c


def _cparams(sem):
    return pltpu.CompilerParams(dimension_semantics=sem,
                                vmem_limit_bytes=_VMEM_LIMIT)


# ----------------------------------------------------------------------------
# Pallas kernels
# ----------------------------------------------------------------------------

def _matmul_kernel(a_ref, b_ref, o_ref):
    """Tiled matmul; accumulate directly into the k-resident f32 output block."""
    @pl.when(pl.program_id(2) == 0)
    def _():
        o_ref[...] = jnp.zeros_like(o_ref)
    o_ref[...] += jnp.dot(a_ref[...], b_ref[...],
                          preferred_element_type=jnp.float32)


def _matmul_bias_kernel(a_ref, b_ref, bias_ref, o_ref, *, relu):
    """Tiled matmul with bias (+ optional ReLU) fused at the last K step."""
    @pl.when(pl.program_id(2) == 0)
    def _():
        o_ref[...] = jnp.zeros_like(o_ref)
    o_ref[...] += jnp.dot(a_ref[...], b_ref[...],
                          preferred_element_type=jnp.float32)

    @pl.when(pl.program_id(2) == pl.num_programs(2) - 1)
    def _():
        out = o_ref[...] + bias_ref[...]
        if relu:
            out = jnp.maximum(out, 0.0)
        o_ref[...] = out


def _conv3x3_s1_kernel(x_ref, w_ref, o_ref):
    """Fused direct 3x3 / stride-1 / pad-1 convolution.

    x_ref: (1, H+2, W8+2, tkc) padded input (one image, one Cin tile)
    w_ref: (3, 3, tkc, tnc)
    o_ref: (1, H, W8, tnc)  -- resident across the Cin-tile reduction axis.
    The 9 taps are unrolled in-kernel; the padded input is read from HBM once.
    """
    @pl.when(pl.program_id(2) == 0)
    def _():
        o_ref[...] = jnp.zeros_like(o_ref)

    _, oh, ow, tnc = o_ref.shape
    tkc = x_ref.shape[3]
    acc = jnp.zeros((oh * ow, tnc), jnp.float32)
    for ki in range(3):
        for kj in range(3):
            patch = x_ref[0, ki:ki + oh, kj:kj + ow, :]        # (oh, ow, tkc)
            patch = patch.reshape(oh * ow, tkc)                # ow is 8-aligned
            acc = acc + jnp.dot(patch, w_ref[ki, kj],
                                preferred_element_type=jnp.float32)
    o_ref[...] += acc.reshape(1, oh, ow, tnc)


def _bn_stats_kernel(x_ref, s_ref, q_ref):
    """Partial per-channel sum / sum-of-squares, accumulated over row tiles."""
    @pl.when(pl.program_id(0) == 0)
    def _():
        s_ref[...] = jnp.zeros_like(s_ref)
        q_ref[...] = jnp.zeros_like(q_ref)
    x = x_ref[...]
    s_ref[...] += jnp.sum(x, axis=0, keepdims=True)
    q_ref[...] += jnp.sum(x * x, axis=0, keepdims=True)


def _bn_affine_kernel(x_ref, s_ref, q_ref, g_ref, b_ref, o_ref,
                      *, inv_count, eps, relu):
    mean = s_ref[...] * inv_count
    var = jnp.maximum(q_ref[...] * inv_count - mean * mean, 0.0)
    scale = g_ref[...] * lax.rsqrt(var + eps)
    shift = b_ref[...] - mean * scale
    y = x_ref[...] * scale + shift
    if relu:
        y = jnp.maximum(y, 0.0)
    o_ref[...] = y


def _bn_affine_res_kernel(x_ref, r_ref, s_ref, q_ref, g_ref, b_ref, o_ref,
                          *, inv_count, eps):
    mean = s_ref[...] * inv_count
    var = jnp.maximum(q_ref[...] * inv_count - mean * mean, 0.0)
    scale = g_ref[...] * lax.rsqrt(var + eps)
    shift = b_ref[...] - mean * scale
    y = x_ref[...] * scale + shift + r_ref[...]
    o_ref[...] = jnp.maximum(y, 0.0)


def _max_reduce_kernel(x_ref, o_ref):
    """Max over the leading (window-tap) axis: (9, tm, C) -> (tm, C)."""
    o_ref[...] = jnp.max(x_ref[...], axis=0)


def _mean_pool_kernel(x_ref, o_ref):
    """Global average pool for one image; output block is grid-resident."""
    i = pl.program_id(0)
    o_ref[pl.ds(i, 1), :] = jnp.mean(x_ref[0], axis=0, keepdims=True)


# ----------------------------------------------------------------------------
# Pallas-backed ops (wrappers)
# ----------------------------------------------------------------------------

def pallas_matmul(a, b_p, bias, n_out, relu=False):
    """relu?(a @ b + bias).  `b_p` is pre-packed/padded to (Kp, Np)."""
    M, K = a.shape
    Kp, Np = b_p.shape

    if M >= 256:
        Mp, tm = _round_up(M, 256), 256
    else:
        Mp = _round_up(M, 8)
        tm = Mp
    tk = _pick_div(Kp, (512, 384, 256, 128))
    if Np % 128 == 0:
        tn = 256 if Np % 256 == 0 else 128
    else:
        tn = Np

    a_p = a if (Mp == M and Kp == K) else jnp.pad(a, ((0, Mp - M), (0, Kp - K)))

    grid = (Mp // tm, Np // tn, Kp // tk)
    a_spec = pl.BlockSpec((tm, tk), lambda i, j, k: (i, k))
    b_spec = pl.BlockSpec((tk, tn), lambda i, j, k: (k, j))
    o_spec = pl.BlockSpec((tm, tn), lambda i, j, k: (i, j))
    cparams = _cparams(("parallel", "parallel", "arbitrary"))
    out_shape = jax.ShapeDtypeStruct((Mp, Np), _F32)

    if bias is None:
        out = pl.pallas_call(
            _matmul_kernel, out_shape=out_shape,
            grid_spec=pltpu.PrefetchScalarGridSpec(
                num_scalar_prefetch=0, grid=grid,
                in_specs=[a_spec, b_spec], out_specs=o_spec),
            compiler_params=cparams,
        )(a_p, b_p)
    else:
        if bias.shape[0] == Np:
            bias_p = bias.reshape(1, Np)
        else:
            bias_p = jnp.zeros((1, Np), _F32).at[0, :bias.shape[0]].set(bias)
        out = pl.pallas_call(
            functools.partial(_matmul_bias_kernel, relu=relu),
            out_shape=out_shape,
            grid_spec=pltpu.PrefetchScalarGridSpec(
                num_scalar_prefetch=0, grid=grid,
                in_specs=[a_spec, b_spec,
                          pl.BlockSpec((1, tn), lambda i, j, k: (0, j))],
                out_specs=o_spec),
            compiler_params=cparams,
        )(a_p, b_p, bias_p)

    if Mp != M or Np != n_out:
        out = out[:M, :n_out]
    return out


def conv3x3_s1(x, w4):
    """Fused 3x3 / stride-1 / pad-1 conv.  w4: (3, 3, Cin, Cout)."""
    N, H, W, Cin = x.shape
    Cout = w4.shape[3]
    W8 = _round_up(W, 8)                       # keep output width 8-aligned
    xp = jnp.pad(x, ((0, 0), (1, 1), (1, 1 + W8 - W), (0, 0)))
    Hp, Wp = H + 2, W8 + 2
    tkc = _chan_tile(Cin)
    tnc = _chan_tile(Cout)

    out = pl.pallas_call(
        _conv3x3_s1_kernel,
        out_shape=jax.ShapeDtypeStruct((N, H, W8, Cout), _F32),
        grid_spec=pltpu.PrefetchScalarGridSpec(
            num_scalar_prefetch=0,
            grid=(N, Cout // tnc, Cin // tkc),
            in_specs=[
                pl.BlockSpec((1, Hp, Wp, tkc), lambda n, j, k: (n, 0, 0, k)),
                pl.BlockSpec((3, 3, tkc, tnc), lambda n, j, k: (0, 0, k, j)),
            ],
            out_specs=pl.BlockSpec((1, H, W8, tnc),
                                   lambda n, j, k: (n, 0, 0, j))),
        compiler_params=_cparams(("parallel", "parallel", "arbitrary")),
    )(xp, w4)
    if W8 != W:
        out = out[:, :, :W, :]
    return out


def conv_im2col(x, gemm, stride, pad):
    """Strided convs (7x7 s2, 3x3 s2, 1x1 s2) via im2col + tiled Pallas GEMM.
    The GEMM weight is pre-packed/padded in `gemm`."""
    N, H, W, Cin = x.shape
    kh, kw, cout = gemm["kh"], gemm["kw"], gemm["cout"]
    OH = (H + 2 * pad - kh) // stride + 1
    OW = (W + 2 * pad - kw) // stride + 1
    xp = jnp.pad(x, ((0, 0), (pad, pad), (pad, pad), (0, 0))) if pad else x
    cols = [xp[:, ki:ki + stride * OH:stride, kj:kj + stride * OW:stride, :]
            for ki in range(kh) for kj in range(kw)]
    patches = cols[0] if len(cols) == 1 else jnp.concatenate(cols, axis=-1)
    a = patches.reshape(N * OH * OW, kh * kw * Cin)
    out = pallas_matmul(a, gemm["b"], None, cout)
    return out.reshape(N, OH, OW, cout)


def batchnorm2d(x, gamma, beta, relu=False, residual=None, eps=1e-5):
    """Training-mode BatchNorm2d (batch statistics, biased variance), tiled.
    Stats are reduced over the full N*H*W extent (two-pass), optionally fused
    with residual-add + ReLU."""
    N, H, W, C = x.shape
    M = N * H * W
    Mp, tm = _row_tiles(M)
    x2 = _pad_rows(x.reshape(M, C), Mp)       # zero rows do not change sums

    # pass 1: per-channel sum / sumsq, accumulated across row tiles
    s, q = pl.pallas_call(
        _bn_stats_kernel,
        out_shape=(jax.ShapeDtypeStruct((1, C), _F32),
                   jax.ShapeDtypeStruct((1, C), _F32)),
        grid_spec=pltpu.PrefetchScalarGridSpec(
            num_scalar_prefetch=0, grid=(Mp // tm,),
            in_specs=[pl.BlockSpec((tm, C), lambda i: (i, 0))],
            out_specs=[pl.BlockSpec((1, C), lambda i: (0, 0)),
                       pl.BlockSpec((1, C), lambda i: (0, 0))]),
        compiler_params=_cparams(("arbitrary",)),
    )(x2)

    g = gamma.reshape(1, C)
    b = beta.reshape(1, C)
    vec_spec = pl.BlockSpec((1, C), lambda i: (0, 0))
    row_spec = pl.BlockSpec((tm, C), lambda i: (i, 0))
    out_shape = jax.ShapeDtypeStruct((Mp, C), _F32)

    # pass 2: affine (+residual+ReLU)
    if residual is not None:
        r2 = _pad_rows(residual.reshape(M, C), Mp)
        out = pl.pallas_call(
            functools.partial(_bn_affine_res_kernel, inv_count=1.0 / M, eps=eps),
            out_shape=out_shape,
            grid_spec=pltpu.PrefetchScalarGridSpec(
                num_scalar_prefetch=0, grid=(Mp // tm,),
                in_specs=[row_spec, row_spec, vec_spec, vec_spec, vec_spec,
                          vec_spec],
                out_specs=row_spec),
            compiler_params=_cparams(("parallel",)),
        )(x2, r2, s, q, g, b)
    else:
        out = pl.pallas_call(
            functools.partial(_bn_affine_kernel, inv_count=1.0 / M, eps=eps,
                              relu=relu),
            out_shape=out_shape,
            grid_spec=pltpu.PrefetchScalarGridSpec(
                num_scalar_prefetch=0, grid=(Mp // tm,),
                in_specs=[row_spec, vec_spec, vec_spec, vec_spec, vec_spec],
                out_specs=row_spec),
            compiler_params=_cparams(("parallel",)),
        )(x2, s, q, g, b)

    if Mp != M:
        out = out[:M]
    return out.reshape(N, H, W, C)


def maxpool_3x3_s2(x):
    """MaxPool2d(kernel=3, stride=2, padding=1) in NHWC, tiled over rows."""
    N, H, W, C = x.shape
    OH = (H + 2 - 3) // 2 + 1
    OW = (W + 2 - 3) // 2 + 1
    xp = jnp.pad(x, ((0, 0), (1, 1), (1, 1), (0, 0)),
                 constant_values=-jnp.inf)
    cols = [xp[:, ki:ki + 2 * OH:2, kj:kj + 2 * OW:2, :]
            for ki in range(3) for kj in range(3)]
    M = N * OH * OW
    stk = jnp.stack(cols, axis=0).reshape(9, M, C)
    Mp, tm = _row_tiles(M)
    if Mp != M:
        stk = jnp.pad(stk, ((0, 0), (0, Mp - M), (0, 0)))

    out = pl.pallas_call(
        _max_reduce_kernel,
        out_shape=jax.ShapeDtypeStruct((Mp, C), _F32),
        grid_spec=pltpu.PrefetchScalarGridSpec(
            num_scalar_prefetch=0, grid=(Mp // tm,),
            in_specs=[pl.BlockSpec((9, tm, C), lambda i: (0, i, 0))],
            out_specs=pl.BlockSpec((tm, C), lambda i: (i, 0))),
        compiler_params=_cparams(("parallel",)),
    )(stk)
    if Mp != M:
        out = out[:M]
    return out.reshape(N, OH, OW, C)


def global_avgpool(x):
    """AdaptiveAvgPool2d(1) in NHWC -> (N, C), one image per grid step."""
    N, H, W, C = x.shape
    x3 = x.reshape(N, H * W, C)
    return pl.pallas_call(
        _mean_pool_kernel,
        out_shape=jax.ShapeDtypeStruct((N, C), _F32),
        grid_spec=pltpu.PrefetchScalarGridSpec(
            num_scalar_prefetch=0, grid=(N,),
            in_specs=[pl.BlockSpec((1, H * W, C), lambda i: (i, 0, 0))],
            out_specs=pl.BlockSpec((N, C), lambda i: (0, 0))),
        compiler_params=_cparams(("arbitrary",)),
    )(x3)


# ----------------------------------------------------------------------------
# ResNet18 backbone (torchvision structure) + SimCLR projection head
# ----------------------------------------------------------------------------

def basic_block(x, p):
    if p["stride"] == 1:
        out = conv3x3_s1(x, p["conv1_w4"])
    else:
        out = conv_im2col(x, p["conv1"], stride=p["stride"], pad=1)
    out = batchnorm2d(out, p["bn1_g"], p["bn1_b"], relu=True)
    out = conv3x3_s1(out, p["conv2_w4"])
    if "down" in p:
        idn = conv_im2col(x, p["down"], stride=p["stride"], pad=0)
        idn = batchnorm2d(idn, p["down_g"], p["down_b"])
    else:
        idn = x
    # bn2 + residual add + relu fused in one tiled pass
    return batchnorm2d(out, p["bn2_g"], p["bn2_b"], residual=idn)


def resnet18_features(x_nchw, pk):
    x = jnp.transpose(x_nchw, (0, 2, 3, 1))            # NCHW -> NHWC
    x = conv_im2col(x, pk["conv1"], stride=2, pad=3)   # 7x7 s2 p3
    x = batchnorm2d(x, pk["bn1_g"], pk["bn1_b"], relu=True)
    x = maxpool_3x3_s2(x)
    for stage in ("layer1", "layer2", "layer3", "layer4"):
        for blk in pk[stage]:
            x = basic_block(x, blk)
    return x                                           # NHWC feature map


def encoder_resnet_forward(x, pk):
    """x: (batch, seq, C, H, W).  Returns (f, z) like the PyTorch module:
       f: (batch*seq, 512, H/32, W/32) NCHW,  z: (batch, seq, out_dim)."""
    batch, seq, C, H, W = x.shape
    xf = x.reshape(batch * seq, C, H, W)
    f_nhwc = resnet18_features(xf, pk)
    f = jnp.transpose(f_nhwc, (0, 3, 1, 2))            # back to NCHW like torch
    h = global_avgpool(f_nhwc)                         # (batch*seq, 512)
    z = pallas_matmul(h, pk["l1_w"], pk["l1_bias"], pk["l1_w"].shape[1],
                      relu=True)
    z = pallas_matmul(z, pk["l2_w"], pk["l2_bias"], pk["l2_w"].shape[1],
                      relu=False)
    z = z.reshape(batch, seq, -1)
    return f, z


# ----------------------------------------------------------------------------
# Parameter construction (PyTorch layout) + one-time packing to kernel layout
# ----------------------------------------------------------------------------

def _conv_init(key, cout, cin, kh, kw):
    fan_in = cin * kh * kw
    return (jax.random.normal(key, (cout, cin, kh, kw), _F32)
            / np.sqrt(fan_in))


def make_params(key, out_dim=32):
    keys = iter(jax.random.split(key, 64))

    params = {
        "conv1_w": _conv_init(next(keys), 64, 3, 7, 7),
        "bn1_g": jnp.ones((64,), _F32),
        "bn1_b": jnp.zeros((64,), _F32),
    }

    def block(cin, cout, stride):
        bp = {
            "stride": stride,
            "conv1_w": _conv_init(next(keys), cout, cin, 3, 3),
            "bn1_g": jnp.ones((cout,), _F32),
            "bn1_b": jnp.zeros((cout,), _F32),
            "conv2_w": _conv_init(next(keys), cout, cout, 3, 3),
            "bn2_g": jnp.ones((cout,), _F32),
            "bn2_b": jnp.zeros((cout,), _F32),
        }
        if stride != 1 or cin != cout:
            bp["down_w"] = _conv_init(next(keys), cout, cin, 1, 1)
            bp["down_g"] = jnp.ones((cout,), _F32)
            bp["down_b"] = jnp.zeros((cout,), _F32)
        return bp

    params["layer1"] = [block(64, 64, 1), block(64, 64, 1)]
    params["layer2"] = [block(64, 128, 2), block(128, 128, 1)]
    params["layer3"] = [block(128, 256, 2), block(256, 256, 1)]
    params["layer4"] = [block(256, 512, 2), block(512, 512, 1)]

    num_ftrs = 512                                     # resnet18 fc.in_features
    params["l1_w"] = (jax.random.normal(next(keys), (num_ftrs, num_ftrs),
                                        _F32) / np.sqrt(num_ftrs))
    params["l1_b"] = jnp.zeros((num_ftrs,), _F32)
    params["l2_w"] = (jax.random.normal(next(keys), (out_dim, num_ftrs),
                                        _F32) / np.sqrt(num_ftrs))
    params["l2_b"] = jnp.zeros((out_dim,), _F32)
    return params


def _pack_conv_gemm(w):
    """PyTorch (Cout,Cin,kh,kw) -> pre-padded GEMM weight (Kp, Np)."""
    cout, cin, kh, kw = w.shape
    k = kh * kw * cin
    b = jnp.transpose(w, (2, 3, 1, 0)).reshape(k, cout)
    kp = _round_up(k, 128)
    if kp != k:
        b = jnp.pad(b, ((0, kp - k), (0, 0)))
    npad = cout if (cout < 128 or cout % 128 == 0) else _round_up(cout, 128)
    if npad != cout:
        b = jnp.pad(b, ((0, 0), (0, npad - cout)))
    return {"b": b, "cout": cout, "kh": kh, "kw": kw}


def pack_params(params):
    """One-time layout transform: no per-forward weight transposes / padding."""
    pk = {"conv1": _pack_conv_gemm(params["conv1_w"]),
          "bn1_g": params["bn1_g"], "bn1_b": params["bn1_b"]}
    for stage in ("layer1", "layer2", "layer3", "layer4"):
        blocks = []
        for bp in params[stage]:
            nb = {"stride": bp["stride"],
                  "bn1_g": bp["bn1_g"], "bn1_b": bp["bn1_b"],
                  "bn2_g": bp["bn2_g"], "bn2_b": bp["bn2_b"]}
            if bp["stride"] == 1:
                nb["conv1_w4"] = jnp.transpose(bp["conv1_w"], (2, 3, 1, 0))
            else:
                nb["conv1"] = _pack_conv_gemm(bp["conv1_w"])
            nb["conv2_w4"] = jnp.transpose(bp["conv2_w"], (2, 3, 1, 0))
            if "down_w" in bp:
                nb["down"] = _pack_conv_gemm(bp["down_w"])
                nb["down_g"] = bp["down_g"]
                nb["down_b"] = bp["down_b"]
            blocks.append(nb)
        pk[stage] = blocks
    pk["l1_w"] = jnp.transpose(params["l1_w"])         # (in, out) = (512, 512)
    pk["l1_bias"] = params["l1_b"]
    pk["l2_w"] = jnp.transpose(params["l2_w"])         # (512, out_dim)
    pk["l2_bias"] = params["l2_b"]
    return pk


# ----------------------------------------------------------------------------

if __name__ == "__main__":
    key = jax.random.PRNGKey(0)
    pkey, xkey = jax.random.split(key)

    out_dim = 32
    params = make_params(pkey, out_dim=out_dim)
    packed = pack_params(params)

    batch, seq, C, H, W = 2, 2, 3, 64, 64
    x = jax.random.normal(xkey, (batch, seq, C, H, W), jnp.float32)

    f, z = encoder_resnet_forward(x, packed)
    jax.block_until_ready(f)
    jax.block_until_ready(z)

    assert f.shape == (batch * seq, 512, H // 32, W // 32), f.shape
    assert z.shape == (batch, seq, out_dim), z.shape
    assert jnp.all(jnp.isfinite(f)) and jnp.all(jnp.isfinite(z))

    print("KERNEL_OK")
</pallas_src>

<mosaic_0001>
module attributes {stable_mosaic.version = 11 : i64} {
  func.func @_matmul_kernel(%arg0: i32, %arg1: i32, %arg2: i32, %arg3: memref<256x256xf32, #tpu.memory_space<vmem>>, %arg4: memref<256x64xf32, #tpu.memory_space<vmem>>, %arg5: memref<256x64xf32, #tpu.memory_space<vmem>>) attributes {dimension_semantics = [#tpu.dimension_semantics<parallel>, #tpu.dimension_semantics<parallel>, #tpu.dimension_semantics<arbitrary>], iteration_bounds = array<i64: 16, 1, 1>, scalar_prefetch = 0 : i64, scratch_operands = 0 : i64, tpu.core_type = #tpu.core_type<tc>, window_params = [{transform_indices = @transform_0, window_bounds = array<i64: 256, 256>}, {transform_indices = @transform_1, window_bounds = array<i64: 256, 64>}, {transform_indices = @transform_2, window_bounds = array<i64: 256, 64>}]} {
    %c0_i32 = arith.constant 0 : i32
    %0 = arith.cmpi eq, %arg2, %c0_i32 : i32
    %1 = arith.extui %0 : i1 to i32
    %c0_i32_0 = arith.constant 0 : i32
    %2 = arith.cmpi ne, %1, %c0_i32_0 : i32
    scf.if %2 {
      %cst_8 = arith.constant 0.000000e+00 : f32
      %9 = vector.broadcast %cst_8 : f32 to vector<256x64xf32>
      %c0_9 = arith.constant 0 : index
      %c0_10 = arith.constant 0 : index
      %10 = vector.load %arg5[%c0_9, %c0_10] : memref<256x64xf32, #tpu.memory_space<vmem>>, vector<256x64xf32>
      tpu.vector_store %arg5[%c0_9, %c0_10], %9 {strides = array<i32>} : memref<256x64xf32, #tpu.memory_space<vmem>>, vector<256x64xf32>,
    } else {
    }
    %c0 = arith.constant 0 : index
    %c0_1 = arith.constant 0 : index
    %3 = vector.load %arg5[%c0, %c0_1] : memref<256x64xf32, #tpu.memory_space<vmem>>, vector<256x64xf32>
    %c0_2 = arith.constant 0 : index
    %c0_3 = arith.constant 0 : index
    %4 = vector.load %arg3[%c0_2, %c0_3] : memref<256x256xf32, #tpu.memory_space<vmem>>, vector<256x256xf32>
    %c0_4 = arith.constant 0 : index
    %c0_5 = arith.constant 0 : index
    %5 = vector.load %arg4[%c0_4, %c0_5] : memref<256x64xf32, #tpu.memory_space<vmem>>, vector<256x64xf32>
    %cst = arith.constant dense<0.000000e+00> : vector<256x64xf32>
    %6 = tpu.matmul %4, %5, %cst {dimension_numbers = #tpu.dot_dimension_numbers<[1], [0], [0], [1], [0, 0, 1, 1], [], []>} : vector<256x256xf32>, vector<256x64xf32>, vector<256x64xf32> -> vector<256x64xf32>
    %7 = arith.addf %3, %6 : vector<256x64xf32>
    %c0_6 = arith.constant 0 : index
    %c0_7 = arith.constant 0 : index
    %8 = vector.load %arg5[%c0_6, %c0_7] : memref<256x64xf32, #tpu.memory_space<vmem>>, vector<256x64xf32>
    tpu.vector_store %arg5[%c0_6, %c0_7], %7 {strides = array<i32>} : memref<256x64xf32, #tpu.memory_space<vmem>>, vector<256x64xf32>,
    return
  }
  func.func @transform_0(%arg0: i32, %arg1: i32, %arg2: i32) -> (i32, i32) {
    %c0_i32 = arith.constant 0 : i32
    return %arg0, %arg2 : i32, i32
  }
  func.func @transform_1(%arg0: i32, %arg1: i32, %arg2: i32) -> (i32, i32) {
    %c0_i32 = arith.constant 0 : i32
    return %arg2, %arg1 : i32, i32
  }
  func.func @transform_2(%arg0: i32, %arg1: i32, %arg2: i32) -> (i32, i32) {
    %c0_i32 = arith.constant 0 : i32
    return %arg0, %arg1 : i32, i32
  }
}

</mosaic_0001>

<bundles_post_ra>
// kernel: tpu_custom_call.1
= control target key start
LH: loop header
LB: loop body
LE: loop exit
PB: predicated region body
PF: predicated region fallthrough
CT: control target
= control target key end

     0   :  { %7 = vsyncpa [#allocation3], 0  ;;  %s1534_s0 = inlined_call_operand.hbm [shape: f32[4096,256], index: 0, kind: input, shape index: {}]   ;;  %s1535_s1 = inlined_call_operand.vmem [shape: f32[256,64], index: 1, kind: input, shape index: {}]   ;;  %s1536_s2 = inlined_call_operand.vmem [shape: f32[4096,64], index: 2, kind: output, shape index: {}]  }
   0x1   :  { %9 = vsyncpa [#allocation3 + $0x1], 0  ;;  %s1055_s9 = smov 0   ;;  %s1057_s10 = smov 0  }
   0x2   :  { %s1059_s11 = smov 0   ;;  %s1061_s12 = smov 0  }
   0x3   :  { %s1063_s13 = smov 0   ;;  %s1065_s14 = smov 0  }
   0x4 LB: > { %s797_s15 = sadd.s32 4294967295, %s1033_s14   ;;  %s34_s16 = sadd.s32 1, %s1029_s13  ;;  %s1033_s14 = sphi %s1065_s14, %s15_s14   ;;  %s1029_s13 = sphi %s1063_s13, %s1544_s13   ;;  %s1025_s12 = sphi %s1061_s12, %s1543_s12   ;;  %s1021_s11 = sphi %s1059_s11, %s1542_s11   ;;  %s1017_s10 = sphi %s1057_s10, %s1541_s10   ;;  %s1013_s9 = sphi %s1055_s9, %s1540_s9  }
   0x5   : > { %p36_p0 = scmp.ge.s32.totalorder %s34_s16, 16  ;;  %s43_s17 = sadd.s32 1, %s1021_s11 }
   0x6   : > { %p50_p1 = scmp.ne.s32.totalorder %s1021_s11, %s1017_s10  ;;  %p51_p2 = scmp.eq.s32.totalorder %s1033_s14, 0 }
   0x7   : > { %s1546_s16 = smov (%p36_p0, %s34_s16), 0  ;;  %p56_p4 = scmp.ne.s32.totalorder %s1017_s10, %s1013_s9 }
   0x8   : > { %p1091_p3 = por %p51_p2, %p50_p1  ;;  %s38_s19 = ssub.s32 %s1029_s13, %s1546_s16 }
   0x9   : > { %p57_p5 = scmp.eq.s32.totalorder %s797_s15, 0  ;;  %p41_p6 = scmp.eq.s32.totalorder %s38_s19, 0 }
   0xa   : > { %p900_p8 = scmp.lt.s32.totalorder %s1033_s14, 16  ;;  %s148_s22 = sand.u32 1, %s1021_s11  }
   0xb   : > { %p1098_p7 = por %p57_p5, %p56_p4  ;;  %s813_s23 = sshll.u32 %s1029_s13, 13 }
   0xc   : > { %s1104_s21 = scalar_select %p41_p6, %s1021_s11, %s43_s17  }
   0xd   : > { %s802_s24 = sshll.u32 %s148_s22, 9  ;;  %s1111_s27 = scalar_lea.hbm %s1534_s0, %s813_s23 }
   0xe   : > { %s152_s28 = scalar_lea.vmem [#allocation2], %s802_s24  ;;  %p1115_p9 = pnand %p900_p8, %p1091_p3 }
   0xf   : > { %s162_s29 = sshll.u32 %s152_s28, 4  ;;  %s1121_s3 = scalar_lea.sflag [#allocation3], %s148_s22  ;;  %s1119_s29 = int_to_ptr.vmem [resolvable:$true] %s162_s29 }
  0x10   : > { %s953_s4 = scalar_lea.hbm %s1111_s27, 8192  ;;  %p955_p11 = pneg %p1115_p9 }
  0x11   : > { %p954_p10 = scmp.ne.s32.totalorder %s1111_s27, %s953_s4  ;;  %s958_s7 = scalar_lea.hbm %s1534_s0, 131072 }
  0x12   : > { %p959_p0 = scmp.lt.u32.totalorder %s1111_s27, %s1534_s0  ;;  %p960_p1 = scmp.lt.u32.totalorder %s958_s7, %s953_s4 }
  0x13   : > { %p956_p12 = pnand %p955_p11, %p954_p10  ;;  %p962_p3 = scmp.lt.u32.totalorder %s953_s4, %s1111_s27 }
  0x14   : > { %p961_p2 = por %p960_p1, %p959_p0 }
  0x15   : > { %p957_p13 = pneg %p956_p12 }
  0x16   : > { %p963_p4 = por %p962_p3, %p961_p2 }
  0x18   : > { %p964_p5 = pnand %p963_p4, %p957_p13 }
  0x1a   : > { %967 = shalt.err (!%p964_p5)
}
  0x1b   : > { %s968_s15 = scalar_lea.vmem %s1119_s29, 8192  ;;  %s1035_s17 = smov [#allocation2]  }
  0x1c   : > { %p969_p6 = scmp.ne.s32.totalorder %s1119_s29, %s968_s15  ;;  %s973_s18 = sshll.u32 %s1035_s17, 4  ;;  %s974_s18 = int_to_ptr.vmem [resolvable:$false] %s973_s18 }
  0x1d   : > { %s975_s19 = scalar_lea.vmem %s974_s18, 16384  ;;  %p976_p12 = scmp.lt.s32.totalorder %s1119_s29, %s974_s18 }
  0x1e   : > { %p971_p8 = pnand %p969_p6, %p955_p11  ;;  %p977_p0 = scmp.lt.s32.totalorder %s975_s19, %s968_s15 }
  0x20   : > { %p972_p10 = pneg %p971_p8  ;;  %p978_p1 = por %p977_p0, %p976_p12 }
  0x22   : > { %p979_p2 = pnand %p978_p1, %p972_p10 }
  0x24   : > { %982 = shalt.err (!%p979_p2)
}
  0x25   : > { %s1036_s22 = smov 256   ;;  %s1037_s23 = smov 16  }
  0x26   : > { %899 = dma.hbm_to_vmem [thread:$0]  (!%p1115_p9), %s1111_s27, 8192, %s1119_s29, %s1121_s3, %s1036_s22, %s1036_s22, %s1037_s23  }
  0x27   : > { %p806_p11 = scmp.ge.s32.totalorder %s1033_s14, 1  ;;  %p170_p13 = scmp.lt.s32.totalorder %s1033_s14, 17 }
  0x29   : > { %p171_p3 = pnand %p806_p11, %p170_p13 }
  0x2a   : > { %s176_s24 = sand.u32 (!%p171_p3), 1, %s1017_s10  }
  0x2b   : > { %174 = sbr.rel (%p171_p3) target bundleno = 392 (0x188), region = 28  ;;  %s807_s25 = sshll.u32 (!%p171_p3), %s176_s24, 9 }
  0x2c   : > { %s177_s26 = scalar_lea.sflag (!%p171_p3), [#allocation3], %s176_s24  ;;  %s1152_s28 = scalar_lea.vmem (!%p171_p3), [#allocation2], %s807_s25 }
  0x32   : > { %1008 = dma.done.wait (%p1098_p7), %s177_s26, 8192  }
  0x33   : > { %1010 = vsyncadd (%p1098_p7), %s177_s26, 4294959104  ;;  %v1038_v0 = vmov 0.0|0.0   ;;  %s808_s27 = sshll.u32 %s1025_s12, 5  ;;  %v365_v1 = vld [vmem:[%s1535_s1] sm:$0xff]  ;;  %v366_v2 = vld [vmem:[%s1535_s1 + $0x8] sm:$0xff]  ;;  %vm236_vm0 = vcmask 523264  }
  0x34   : > { %814 = vmatprep.subr.bf16.mxu0 %v1038_v0  ;;  %862 = vmatprep.subr.bf16.mxu1 %v1038_v0  ;;  %p224_p9 = scmp.lt.s32.totalorder %s808_s27, 511  ;;  %v367_v3 = vld [vmem:[%s1535_s1 + $0x10] sm:$0xff]  ;;  %v815_v4 = vpack.c.bf16 %v366_v2, %v365_v1  ;;  %v368_v5 = vld [vmem:[%s1535_s1 + $0x18] sm:$0xff]  ;;  %v369_v7 = vld [vmem:[%s1535_s1 + $0x20] sm:$0xff]  ;;  %v1039_v9 = vmov 0.0  }
  0x35   : > { %v818_v6 = vpack.c.bf16 %v368_v5, %v367_v3  ;;  %v370_v8 = vld [vmem:[%s1535_s1 + $0x28] sm:$0xff]  ;;  %v371_v11 = vld [vmem:[%s1535_s1 + $0x30] sm:$0xff]  ;;  %v372_v12 = vld [vmem:[%s1535_s1 + $0x38] sm:$0xff] }
  0x36   : > { %s1548_s27 = smov (!%p224_p9, %s808_s27), 511  ;;  %816 = vmatpush1.bf16.msra.mxu0 %v815_v4  ;;  %878 = vmatpush1.bf16.msra.mxu1 %v815_v4  ;;  %v821_v10 = vpack.c.bf16 %v370_v8, %v369_v7  ;;  %v302_v13 = vld [vmem:[%s1152_s28 + $0x8] sm:$0xff]  ;;  %v824_v14 = vpack.c.bf16 %v372_v12, %v371_v11  ;;  %v373_v16 = vld [vmem:[%s1535_s1 + $0x40] sm:$0xff]  ;;  %v375_v19 = vld [vmem:[%s1535_s1 + $0x50] sm:$0xff] }
  0x37   : > { %s809_s12 = sshll.u32 %s1548_s27, 3  ;;  %817 = vmatprep.subr.bf16.mxu0 %v1038_v0  ;;  %863 = vmatprep.subr.bf16.mxu1 %v1038_v0  ;;  %v334_v15 = vld [vmem:[%s1152_s28 + $0x108] sm:$0xff]  ;;  %v376_v20 = vld [vmem:[%s1535_s1 + $0x58] sm:$0xff]  ;;  %v377_v22 = vld [vmem:[%s1535_s1 + $0x60] sm:$0xff] }
  0x38   : > { %s1184_s22 = scalar_lea.vmem %s1536_s2, %s809_s12  ;;  %v374_v17 = vld [vmem:[%s1535_s1 + $0x48] sm:$0xff]  ;;  %461 = vmatprep.mubr.f32.mxu0 %v302_v13  ;;  %541 = vmatprep.mubr.f32.mxu1 %v334_v15  ;;  %v830_v21 = vpack.c.bf16 %v376_v20, %v375_v19  ;;  %v379_v25 = vld [vmem:[%s1535_s1 + $0x70] sm:$0xff]  ;;  %v380_v26 = vld [vmem:[%s1535_s1 + $0x78] sm:$0xff] }
  0x39   : > { %237 = vst.msk [vmem:[%s1184_s22] sm:$0xff] %vm236_vm0, %v1039_v9  ;;  %238 = vst.msk [vmem:[%s1184_s22 + $0x8] sm:$0xff] %vm236_vm0, %v1039_v9  ;;  %v827_v18 = vpack.c.bf16 %v374_v17, %v373_v16  ;;  %v378_v23 = vld [vmem:[%s1535_s1 + $0x68] sm:$0xff]  ;;  %v836_v27 = vpack.c.bf16 %v380_v26, %v379_v25  ;;  %v381_v28 = vld [vmem:[%s1535_s1 + $0x80] sm:$0xff] }
  0x3a   : > { %239 = vst.msk [vmem:[%s1184_s22 + $0x10] sm:$0xff] %vm236_vm0, %v1039_v9  ;;  %240 = vst.msk [vmem:[%s1184_s22 + $0x18] sm:$0xff] %vm236_vm0, %v1039_v9  ;;  %819 = vmatpush1.bf16.msra.mxu0 %v818_v6  ;;  %879 = vmatpush1.bf16.msra.mxu1 %v818_v6  ;;  %v833_v24 = vpack.c.bf16 %v378_v23, %v377_v22  ;;  %v382_v29 = vld [vmem:[%s1535_s1 + $0x88] sm:$0xff]  ;;  %v383_v31 = vld [vmem:[%s1535_s1 + $0x90] sm:$0xff] }
  0x3b   : > { %241 = vst.msk [vmem:[%s1184_s22 + $0x20] sm:$0xff] %vm236_vm0, %v1039_v9  ;;  %242 = vst.msk [vmem:[%s1184_s22 + $0x28] sm:$0xff] %vm236_vm0, %v1039_v9  ;;  %820 = vmatprep.subr.bf16.mxu0 %v1038_v0  ;;  %864 = vmatprep.subr.bf16.mxu1 %v1038_v0  ;;  %v839_v30 = vpack.c.bf16 %v382_v29, %v381_v28  ;;  %v384_v32 = vld [vmem:[%s1535_s1 + $0x98] sm:$0xff]  ;;  %v385_v34 = vld [vmem:[%s1535_s1 + $0xa0] sm:$0xff] }
  0x3c   : > { %243 = vst.msk [vmem:[%s1184_s22 + $0x30] sm:$0xff] %vm236_vm0, %v1039_v9  ;;  %244 = vst.msk [vmem:[%s1184_s22 + $0x38] sm:$0xff] %vm236_vm0, %v1039_v9  ;;  %v842_v33 = vpack.c.bf16 %v384_v32, %v383_v31  ;;  %v386_v35 = vld [vmem:[%s1535_s1 + $0xa8] sm:$0xff]  ;;  %v387_v37 = vld [vmem:[%s1535_s1 + $0xb0] sm:$0xff] }
  0x3d   : > { %245 = vst.msk [vmem:[%s1184_s22 + $0x40] sm:$0xff] %vm236_vm0, %v1039_v9  ;;  %246 = vst.msk [vmem:[%s1184_s22 + $0x48] sm:$0xff] %vm236_vm0, %v1039_v9  ;;  %v845_v36 = vpack.c.bf16 %v386_v35, %v385_v34  ;;  %v388_v38 = vld [vmem:[%s1535_s1 + $0xb8] sm:$0xff]  ;;  %v389_v40 = vld [vmem:[%s1535_s1 + $0xc0] sm:$0xff] }
  0x3e   : > { %247 = vst.msk [vmem:[%s1184_s22 + $0x50] sm:$0xff] %vm236_vm0, %v1039_v9  ;;  %248 = vst.msk [vmem:[%s1184_s22 + $0x58] sm:$0xff] %vm236_vm0, %v1039_v9  ;;  %822 = vmatpush1.bf16.msra.mxu0 %v821_v10  ;;  %880 = vmatpush1.bf16.msra.mxu1 %v821_v10  ;;  %v848_v39 = vpack.c.bf16 %v388_v38, %v387_v37  ;;  %v390_v41 = vld [vmem:[%s1535_s1 + $0xc8] sm:$0xff]  ;;  %v391_v43 = vld [vmem:[%s1535_s1 + $0xd0] sm:$0xff] }
  0x3f   : > { %249 = vst.msk [vmem:[%s1184_s22 + $0x60] sm:$0xff] %vm236_vm0, %v1039_v9  ;;  %250 = vst.msk [vmem:[%s1184_s22 + $0x68] sm:$0xff] %vm236_vm0, %v1039_v9  ;;  %823 = vmatprep.subr.bf16.mxu0 %v1038_v0  ;;  %865 = vmatprep.subr.bf16.mxu1 %v1038_v0  ;;  %v851_v42 = vpack.c.bf16 %v390_v41, %v389_v40  ;;  %v392_v44 = vld [vmem:[%s1535_s1 + $0xd8] sm:$0xff]  ;;  %v393_v46 = vld [vmem:[%s1535_s1 + $0xe0] sm:$0xff] }
  0x40   : > { %251 = vst.msk [vmem:[%s1184_s22 + $0x70] sm:$0xff] %vm236_vm0, %v1039_v9  ;;  %252 = vst.msk [vmem:[%s1184_s22 + $0x78] sm:$0xff] %vm236_vm0, %v1039_v9  ;;  %v854_v45 = vpack.c.bf16 %v392_v44, %v391_v43  ;;  %v394_v47 = vld [vmem:[%s1535_s1 + $0xe8] sm:$0xff]  ;;  %v395_v49 = vld [vmem:[%s1535_s1 + $0xf0] sm:$0xff] }
  0x41   : > { %253 = vst.msk [vmem:[%s1184_s22 + $0x80] sm:$0xff] %vm236_vm0, %v1039_v9  ;;  %254 = vst.msk [vmem:[%s1184_s22 + $0x88] sm:$0xff] %vm236_vm0, %v1039_v9  ;;  %v857_v48 = vpack.c.bf16 %v394_v47, %v393_v46  ;;  %v396_v50 = vld [vmem:[%s1535_s1 + $0xf8] sm:$0xff]  ;;  %v301_v52 = vld [vmem:[%s1152_s28] sm:$0xff] }
  0x42   : > { %255 = vst.msk [vmem:[%s1184_s22 + $0x90] sm:$0xff] %vm236_vm0, %v1039_v9  ;;  %256 = vst.msk [vmem:[%s1184_s22 + $0x98] sm:$0xff] %vm236_vm0, %v1039_v9  ;;  %825 = vmatpush1.bf16.msra.mxu0 %v824_v14  ;;  %881 = vmatpush1.bf16.msra.mxu1 %v824_v14  ;;  %v860_v51 = vpack.c.bf16 %v396_v50, %v395_v49  ;;  %v333_v53 = vld [vmem:[%s1152_s28 + $0x100] sm:$0xff]  ;;  %v304_v54 = vld [vmem:[%s1152_s28 + $0x18] sm:$0xff] }
  0x43   : > { %257 = vst.msk [vmem:[%s1184_s22 + $0xa0] sm:$0xff] %vm236_vm0, %v1039_v9  ;;  %258 = vst.msk [vmem:[%s1184_s22 + $0xa8] sm:$0xff] %vm236_vm0, %v1039_v9  ;;  %826 = vmatprep.subr.bf16.mxu0 %v1038_v0  ;;  %866 = vmatprep.subr.bf16.mxu1 %v1038_v0  ;;  %v336_v55 = vld [vmem:[%s1152_s28 + $0x118] sm:$0xff]  ;;  %v303_v56 = vld [vmem:[%s1152_s28 + $0x10] sm:$0xff] }
  0x44   : > { %259 = vst.msk [vmem:[%s1184_s22 + $0xb0] sm:$0xff] %vm236_vm0, %v1039_v9  ;;  %260 = vst.msk [vmem:[%s1184_s22 + $0xb8] sm:$0xff] %vm236_vm0, %v1039_v9  ;;  %v335_v57 = vld [vmem:[%s1152_s28 + $0x110] sm:$0xff]  ;;  %v306_v58 = vld [vmem:[%s1152_s28 + $0x28] sm:$0xff] }
  0x45   : > { %261 = vst.msk [vmem:[%s1184_s22 + $0xc0] sm:$0xff] %vm236_vm0, %v1039_v9  ;;  %262 = vst.msk [vmem:[%s1184_s22 + $0xc8] sm:$0xff] %vm236_vm0, %v1039_v9  ;;  %v338_v59 = vld [vmem:[%s1152_s28 + $0x128] sm:$0xff]  ;;  %v305_v60 = vld [vmem:[%s1152_s28 + $0x20] sm:$0xff] }
  0x46   : > { %263 = vst.msk [vmem:[%s1184_s22 + $0xd0] sm:$0xff] %vm236_vm0, %v1039_v9  ;;  %264 = vst.msk [vmem:[%s1184_s22 + $0xd8] sm:$0xff] %vm236_vm0, %v1039_v9  ;;  %828 = vmatpush1.bf16.msra.mxu0 %v827_v18  ;;  %882 = vmatpush1.bf16.msra.mxu1 %v827_v18  ;;  %v337_v61 = vld [vmem:[%s1152_s28 + $0x120] sm:$0xff]  ;;  %v308_v62 = vld [vmem:[%s1152_s28 + $0x38] sm:$0xff] }
  0x47   : > { %265 = vst.msk [vmem:[%s1184_s22 + $0xe0] sm:$0xff] %vm236_vm0, %v1039_v9  ;;  %266 = vst.msk [vmem:[%s1184_s22 + $0xe8] sm:$0xff] %vm236_vm0, %v1039_v9  ;;  %829 = vmatprep.subr.bf16.mxu0 %v1038_v0  ;;  %867 = vmatprep.subr.bf16.mxu1 %v1038_v0  ;;  %v340_v63 = vld [vmem:[%s1152_s28 + $0x138] sm:$0xff]  ;;  %v339_v1 = vld [vmem:[%s1152_s28 + $0x130] sm:$0xff] }
  0x48   : > { %267 = vst.msk [vmem:[%s1184_s22 + $0xf0] sm:$0xff] %vm236_vm0, %v1039_v9  ;;  %268 = vst.msk [vmem:[%s1184_s22 + $0xf8] sm:$0xff] %vm236_vm0, %v1039_v9  ;;  %v310_v2 = vld [vmem:[%s1152_s28 + $0x48] sm:$0xff]  ;;  %v309_v4 = vld [vmem:[%s1152_s28 + $0x40] sm:$0xff] }
  0x49   : > { %v342_v3 = vld [vmem:[%s1152_s28 + $0x148] sm:$0xff]  ;;  %v341_v5 = vld [vmem:[%s1152_s28 + $0x140] sm:$0xff]  ;;  %v312_v6 = vld [vmem:[%s1152_s28 + $0x58] sm:$0xff] }
  0x4a   : > { %831 = vmatpush1.bf16.msra.mxu0 %v830_v21  ;;  %883 = vmatpush1.bf16.msra.mxu1 %v830_v21  ;;  %v344_v7 = vld [vmem:[%s1152_s28 + $0x158] sm:$0xff]  ;;  %v311_v8 = vld [vmem:[%s1152_s28 + $0x50] sm:$0xff]  ;;  %v314_v10 = vld [vmem:[%s1152_s28 + $0x68] sm:$0xff] }
  0x4b   : > { %832 = vmatprep.subr.bf16.mxu0 %v1038_v0  ;;  %868 = vmatprep.subr.bf16.mxu1 %v1038_v0  ;;  %v343_v9 = vld [vmem:[%s1152_s28 + $0x150] sm:$0xff]  ;;  %v346_v11 = vld [vmem:[%s1152_s28 + $0x168] sm:$0xff]  ;;  %v313_v12 = vld [vmem:[%s1152_s28 + $0x60] sm:$0xff] }
  0x4c   : > { %v345_v13 = vld [vmem:[%s1152_s28 + $0x160] sm:$0xff]  ;;  %v316_v14 = vld [vmem:[%s1152_s28 + $0x78] sm:$0xff]  ;;  %v315_v16 = vld [vmem:[%s1152_s28 + $0x70] sm:$0xff] }
  0x4d   : > { %v348_v15 = vld [vmem:[%s1152_s28 + $0x178] sm:$0xff]  ;;  %v347_v17 = vld [vmem:[%s1152_s28 + $0x170] sm:$0xff]  ;;  %v318_v18 = vld [vmem:[%s1152_s28 + $0x88] sm:$0xff] }
  0x4e   : > { %834 = vmatpush1.bf16.msra.mxu0 %v833_v24  ;;  %884 = vmatpush1.bf16.msra.mxu1 %v833_v24  ;;  %v350_v19 = vld [vmem:[%s1152_s28 + $0x188] sm:$0xff]  ;;  %v317_v20 = vld [vmem:[%s1152_s28 + $0x80] sm:$0xff]  ;;  %v320_v22 = vld [vmem:[%s1152_s28 + $0x98] sm:$0xff] }
  0x4f   : > { %835 = vmatprep.subr.bf16.mxu0 %v1038_v0  ;;  %869 = vmatprep.subr.bf16.mxu1 %v1038_v0  ;;  %v349_v21 = vld [vmem:[%s1152_s28 + $0x180] sm:$0xff]  ;;  %v352_v23 = vld [vmem:[%s1152_s28 + $0x198] sm:$0xff]  ;;  %v319_v24 = vld [vmem:[%s1152_s28 + $0x90] sm:$0xff] }
  0x50   : > { %v351_v25 = vld [vmem:[%s1152_s28 + $0x190] sm:$0xff]  ;;  %v322_v26 = vld [vmem:[%s1152_s28 + $0xa8] sm:$0xff]  ;;  %v321_v28 = vld [vmem:[%s1152_s28 + $0xa0] sm:$0xff] }
  0x51   : > { %v353_v29 = vld [vmem:[%s1152_s28 + $0x1a0] sm:$0xff]  ;;  %v356_v31 = vld [vmem:[%s1152_s28 + $0x1b8] sm:$0xff]  ;;  %v323_v32 = vld [vmem:[%s1152_s28 + $0xb0] sm:$0xff] }
  0x52   : > { %837 = vmatpush1.bf16.msra.mxu0 %v836_v27  ;;  %885 = vmatpush1.bf16.msra.mxu1 %v836_v27  ;;  %v354_v27 = vld [vmem:[%s1152_s28 + $0x1a8] sm:$0xff]  ;;  %v357_v37 = vld [vmem:[%s1152_s28 + $0x1c0] sm:$0xff]  ;;  %v328_v38 = vld [vmem:[%s1152_s28 + $0xd8] sm:$0xff] }
  0x53   : > { %838 = vmatprep.subr.bf16.mxu0 %v1038_v0  ;;  %870 = vmatprep.subr.bf16.mxu1 %v1038_v0  ;;  %v326_v34 = vld [vmem:[%s1152_s28 + $0xc8] sm:$0xff]  ;;  %v327_v40 = vld [vmem:[%s1152_s28 + $0xd0] sm:$0xff]  ;;  %v329_v44 = vld [vmem:[%s1152_s28 + $0xe0] sm:$0xff] }
  0x54   : > { %v358_v35 = vld [vmem:[%s1152_s28 + $0x1c8] sm:$0xff]  ;;  %v359_v41 = vld [vmem:[%s1152_s28 + $0x1d0] sm:$0xff]  ;;  %v332_v46 = vld [vmem:[%s1152_s28 + $0xf8] sm:$0xff] }
  0x55   : > { %v362_v43 = vld [vmem:[%s1152_s28 + $0x1e8] sm:$0xff]  ;;  %v364_v47 = vld [vmem:[%s1152_s28 + $0x1f8] sm:$0xff]  ;;  %v363_v49 = vld [vmem:[%s1152_s28 + $0x1f0] sm:$0xff] }
  0x56   : > { %840 = vmatpush1.bf16.msra.mxu0 %v839_v30  ;;  %886 = vmatpush1.bf16.msra.mxu1 %v839_v30  ;;  %v324_v30 = vld [vmem:[%s1152_s28 + $0xb8] sm:$0xff]  ;;  %v269_v50 = vld [vmem:[%s1184_s22] sm:$0xff] }
  0x57   : > { %841 = vmatprep.subr.bf16.mxu0 %v1038_v0  ;;  %871 = vmatprep.subr.bf16.mxu1 %v1038_v0 }
  0x5a   : > { %843 = vmatpush1.bf16.msra.mxu0 %v842_v33  ;;  %887 = vmatpush1.bf16.msra.mxu1 %v842_v33  ;;  %v355_v33 = vld [vmem:[%s1152_s28 + $0x1b0] sm:$0xff] }
  0x5b   : > { %844 = vmatprep.subr.bf16.mxu0 %v1038_v0  ;;  %872 = vmatprep.subr.bf16.mxu1 %v1038_v0 }
  0x5e   : > { %846 = vmatpush1.bf16.msra.mxu0 %v845_v36  ;;  %888 = vmatpush1.bf16.msra.mxu1 %v845_v36  ;;  %v325_v36 = vld [vmem:[%s1152_s28 + $0xc0] sm:$0xff] }
  0x5f   : > { %847 = vmatprep.subr.bf16.mxu0 %v1038_v0  ;;  %873 = vmatprep.subr.bf16.mxu1 %v1038_v0 }
  0x62   : > { %849 = vmatpush1.bf16.msra.mxu0 %v848_v39  ;;  %889 = vmatpush1.bf16.msra.mxu1 %v848_v39  ;;  %v360_v39 = vld [vmem:[%s1152_s28 + $0x1d8] sm:$0xff] }
  0x63   : > { %850 = vmatprep.subr.bf16.mxu0 %v1038_v0  ;;  %874 = vmatprep.subr.bf16.mxu1 %v1038_v0 }
  0x66   : > { %852 = vmatpush1.bf16.msra.mxu0 %v851_v42  ;;  %890 = vmatpush1.bf16.msra.mxu1 %v851_v42  ;;  %v330_v42 = vld [vmem:[%s1152_s28 + $0xe8] sm:$0xff] }
  0x67   : > { %853 = vmatprep.subr.bf16.mxu0 %v1038_v0  ;;  %875 = vmatprep.subr.bf16.mxu1 %v1038_v0 }
  0x6a   : > { %855 = vmatpush1.bf16.msra.mxu0 %v854_v45  ;;  %891 = vmatpush1.bf16.msra.mxu1 %v854_v45  ;;  %v361_v45 = vld [vmem:[%s1152_s28 + $0x1e0] sm:$0xff] }
  0x6b   : > { %856 = vmatprep.subr.bf16.mxu0 %v1038_v0  ;;  %876 = vmatprep.subr.bf16.mxu1 %v1038_v0 }
  0x6e   : > { %858 = vmatpush1.bf16.msra.mxu0 %v857_v48  ;;  %892 = vmatpush1.bf16.msra.mxu1 %v857_v48  ;;  %v331_v48 = vld [vmem:[%s1152_s28 + $0xf0] sm:$0xff] }
  0x6f   : > { %859 = vmatprep.subr.bf16.mxu0 %v1038_v0  ;;  %877 = vmatprep.subr.bf16.mxu1 %v1038_v0  ;;  %v307_v0 = vld [vmem:[%s1152_s28 + $0x30] sm:$0xff] }
  0x72   : > { %861 = vmatpush1.bf16.msra.mxu0 %v860_v51  ;;  %893 = vmatpush1.bf16.msra.mxu1 %v860_v51  ;;  %v285_v51 = vld [vmem:[%s1184_s22 + $0x80] sm:$0xff] }
  0x75   : > { %462 = vmatmul.mubr.f32.vlgmr.msra.gmra.mrb[0].mxu0 %v301_v52  ;;  %542 = vmatmul.mubr.f32.vlgmr.msra.gmra.mrb[0].mxu1 %v333_v53 }
  0x76   : > { %466 = vmatprep.mubr.f32.mxu0 %v304_v54  ;;  %546 = vmatprep.mubr.f32.mxu1 %v336_v55 }
  0x79   : > { %467 = vmatmul.mubr.f32.gmra.mrb[2].mxu0 %v303_v56  ;;  %547 = vmatmul.mubr.f32.gmra.mrb[2].mxu1 %v335_v57 }
  0x7a   : > { %471 = vmatprep.mubr.f32.mxu0 %v306_v58  ;;  %551 = vmatprep.mubr.f32.mxu1 %v338_v59  ;;  %v270_v58 = vld [vmem:[%s1184_s22 + $0x8] sm:$0xff] }
  0x7b   : > { %v286_v59 = vld [vmem:[%s1184_s22 + $0x88] sm:$0xff] }
  0x7d   : > { %472 = vmatmul.mubr.f32.gmra.mrb[4].mxu0 %v305_v60  ;;  %552 = vmatmul.mubr.f32.gmra.mrb[4].mxu1 %v337_v61 }
  0x7e   : > { %476 = vmatprep.mubr.f32.mxu0 %v308_v62  ;;  %556 = vmatprep.mubr.f32.mxu1 %v340_v63 }
  0x81   : > { %477 = vmatmul.mubr.f32.gmra.mrb[6].mxu0 %v307_v0  ;;  %557 = vmatmul.mubr.f32.gmra.mrb[6].mxu1 %v339_v1 }
  0x82   : > { %481 = vmatprep.mubr.f32.mxu0 %v310_v2  ;;  %561 = vmatprep.mubr.f32.mxu1 %v342_v3  ;;  %v271_v2 = vld [vmem:[%s1184_s22 + $0x10] sm:$0xff] }
  0x83   : > { %v287_v3 = vld [vmem:[%s1184_s22 + $0x90] sm:$0xff] }
  0x85   : > { %482 = vmatmul.mubr.f32.gmra.mrb[8].mxu0 %v309_v4  ;;  %562 = vmatmul.mubr.f32.gmra.mrb[8].mxu1 %v341_v5 }
  0x86   : > { %486 = vmatprep.mubr.f32.mxu0 %v312_v6  ;;  %566 = vmatprep.mubr.f32.mxu1 %v344_v7 }
  0x89   : > { %487 = vmatmul.mubr.f32.gmra.mrb[10].mxu0 %v311_v8  ;;  %567 = vmatmul.mubr.f32.gmra.mrb[10].mxu1 %v343_v9 }
  0x8a   : > { %491 = vmatprep.mubr.f32.mxu0 %v314_v10  ;;  %571 = vmatprep.mubr.f32.mxu1 %v346_v11  ;;  %v272_v10 = vld [vmem:[%s1184_s22 + $0x18] sm:$0xff] }
  0x8b   : > { %v288_v11 = vld [vmem:[%s1184_s22 + $0x98] sm:$0xff] }
  0x8d   : > { %492 = vmatmul.mubr.f32.gmra.mrb[12].mxu0 %v313_v12  ;;  %572 = vmatmul.mubr.f32.gmra.mrb[12].mxu1 %v345_v13 }
  0x8e   : > { %496 = vmatprep.mubr.f32.mxu0 %v316_v14  ;;  %576 = vmatprep.mubr.f32.mxu1 %v348_v15 }
  0x91   : > { %497 = vmatmul.mubr.f32.gmra.mrb[14].mxu0 %v315_v16  ;;  %577 = vmatmul.mubr.f32.gmra.mrb[14].mxu1 %v347_v17 }
  0x92   : > { %501 = vmatprep.mubr.f32.mxu0 %v318_v18  ;;  %581 = vmatprep.mubr.f32.mxu1 %v350_v19  ;;  %v273_v18 = vld [vmem:[%s1184_s22 + $0x20] sm:$0xff] }
  0x93   : > { %v289_v19 = vld [vmem:[%s1184_s22 + $0xa0] sm:$0xff] }
  0x95   : > { %502 = vmatmul.mubr.f32.gmra.mrb[16].mxu0 %v317_v20  ;;  %582 = vmatmul.mubr.f32.gmra.mrb[16].mxu1 %v349_v21 }
  0x96   : > { %506 = vmatprep.mubr.f32.mxu0 %v320_v22  ;;  %586 = vmatprep.mubr.f32.mxu1 %v352_v23 }
  0x99   : > { %507 = vmatmul.mubr.f32.gmra.mrb[18].mxu0 %v319_v24  ;;  %587 = vmatmul.mubr.f32.gmra.mrb[18].mxu1 %v351_v25 }
  0x9a   : > { %511 = vmatprep.mubr.f32.mxu0 %v322_v26  ;;  %591 = vmatprep.mubr.f32.mxu1 %v354_v27  ;;  %v274_v26 = vld [vmem:[%s1184_s22 + $0x28] sm:$0xff] }
  0x9b   : > { %v290_v27 = vld [vmem:[%s1184_s22 + $0xa8] sm:$0xff] }
  0x9d   : > { %512 = vmatmul.mubr.f32.gmra.mrb[20].mxu0 %v321_v28  ;;  %592 = vmatmul.mubr.f32.gmra.mrb[20].mxu1 %v353_v29 }
  0x9e   : > { %516 = vmatprep.mubr.f32.mxu0 %v324_v30  ;;  %596 = vmatprep.mubr.f32.mxu1 %v356_v31 }
  0xa1   : > { %517 = vmatmul.mubr.f32.gmra.mrb[22].mxu0 %v323_v32  ;;  %597 = vmatmul.mubr.f32.gmra.mrb[22].mxu1 %v355_v33 }
  0xa2   : > { %521 = vmatprep.mubr.f32.mxu0 %v326_v34  ;;  %601 = vmatprep.mubr.f32.mxu1 %v358_v35  ;;  %v275_v34 = vld [vmem:[%s1184_s22 + $0x30] sm:$0xff] }
  0xa3   : > { %v291_v35 = vld [vmem:[%s1184_s22 + $0xb0] sm:$0xff] }
  0xa5   : > { %522 = vmatmul.mubr.f32.gmra.mrb[24].mxu0 %v325_v36  ;;  %602 = vmatmul.mubr.f32.gmra.mrb[24].mxu1 %v357_v37 }
  0xa6   : > { %526 = vmatprep.mubr.f32.mxu0 %v328_v38  ;;  %606 = vmatprep.mubr.f32.mxu1 %v360_v39 }
  0xa9   : > { %527 = vmatmul.mubr.f32.gmra.mrb[26].mxu0 %v327_v40  ;;  %607 = vmatmul.mubr.f32.gmra.mrb[26].mxu1 %v359_v41 }
  0xaa   : > { %531 = vmatprep.mubr.f32.mxu0 %v330_v42  ;;  %611 = vmatprep.mubr.f32.mxu1 %v362_v43  ;;  %v276_v42 = vld [vmem:[%s1184_s22 + $0x38] sm:$0xff] }
  0xab   : > { %v292_v43 = vld [vmem:[%s1184_s22 + $0xb8] sm:$0xff] }
  0xad   : > { %532 = vmatmul.mubr.f32.gmra.mrb[28].mxu0 %v329_v44  ;;  %612 = vmatmul.mubr.f32.gmra.mrb[28].mxu1 %v361_v45 }
  0xae   : > { %536 = vmatprep.mubr.f32.mxu0 %v332_v46  ;;  %616 = vmatprep.mubr.f32.mxu1 %v364_v47 }
  0xb1   : > { %537 = vmatmul.mubr.f32.gmra.mrb[30].mxu0 %v331_v48  ;;  %617 = vmatmul.mubr.f32.gmra.mrb[30].mxu1 %v363_v49 }
 0x148   : > { %v463_v52 = vpop.f32.mrb[0].mxu0  ;;  %v543_v53 = vpop.f32.mrb[0].mxu1 }
 0x149   : > { %v622_v54 = vadd.f32 %v463_v52, %v269_v50  ;;  %v638_v55 = vadd.f32 %v543_v53, %v285_v51  ;;  %v465_v56 = vpop.f32.mrb[1].mxu0  ;;  %v545_v57 = vpop.f32.mrb[1].mxu1  ;;  %v277_v50 = vld [vmem:[%s1184_s22 + $0x40] sm:$0xff] }
 0x14a   : > { %v293_v51 = vld [vmem:[%s1184_s22 + $0xc0] sm:$0xff] }
 0x14b   : > { %655 = vst.msk [vmem:[%s1184_s22] sm:$0xff] %vm236_vm0, %v622_v54  ;;  %671 = vst.msk [vmem:[%s1184_s22 + $0x80] sm:$0xff] %vm236_vm0, %v638_v55 }
 0x14c   : > { %v468_v60 = vpop.f32.mrb[2].mxu0  ;;  %v548_v61 = vpop.f32.mrb[2].mxu1 }
 0x14d   : > { %v623_v62 = vadd.f32 %v468_v60, %v270_v58  ;;  %v639_v63 = vadd.f32 %v548_v61, %v286_v59  ;;  %v470_v0 = vpop.f32.mrb[3].mxu0  ;;  %v550_v1 = vpop.f32.mrb[3].mxu1  ;;  %v278_v58 = vld [vmem:[%s1184_s22 + $0x48] sm:$0xff] }
 0x14e   : > { %v294_v59 = vld [vmem:[%s1184_s22 + $0xc8] sm:$0xff] }
 0x14f   : > { %656 = vst.msk [vmem:[%s1184_s22 + $0x8] sm:$0xff] %vm236_vm0, %v623_v62  ;;  %672 = vst.msk [vmem:[%s1184_s22 + $0x88] sm:$0xff] %vm236_vm0, %v639_v63 }
 0x150   : > { %v473_v4 = vpop.f32.mrb[4].mxu0  ;;  %v553_v5 = vpop.f32.mrb[4].mxu1 }
 0x151   : > { %v624_v6 = vadd.f32 %v473_v4, %v271_v2  ;;  %v640_v7 = vadd.f32 %v553_v5, %v287_v3  ;;  %v475_v8 = vpop.f32.mrb[5].mxu0  ;;  %v555_v9 = vpop.f32.mrb[5].mxu1  ;;  %v279_v2 = vld [vmem:[%s1184_s22 + $0x50] sm:$0xff] }
 0x152   : > { %v295_v3 = vld [vmem:[%s1184_s22 + $0xd0] sm:$0xff] }
 0x153   : > { %657 = vst.msk [vmem:[%s1184_s22 + $0x10] sm:$0xff] %vm236_vm0, %v624_v6  ;;  %673 = vst.msk [vmem:[%s1184_s22 + $0x90] sm:$0xff] %vm236_vm0, %v640_v7 }
 0x154   : > { %v478_v12 = vpop.f32.mrb[6].mxu0  ;;  %v558_v13 = vpop.f32.mrb[6].mxu1 }
 0x155   : > { %v625_v14 = vadd.f32 %v478_v12, %v272_v10  ;;  %v641_v15 = vadd.f32 %v558_v13, %v288_v11  ;;  %v480_v16 = vpop.f32.mrb[7].mxu0  ;;  %v560_v17 = vpop.f32.mrb[7].mxu1  ;;  %v280_v10 = vld [vmem:[%s1184_s22 + $0x58] sm:$0xff] }
 0x156   : > { %v296_v11 = vld [vmem:[%s1184_s22 + $0xd8] sm:$0xff] }
 0x157   : > { %658 = vst.msk [vmem:[%s1184_s22 + $0x18] sm:$0xff] %vm236_vm0, %v625_v14  ;;  %674 = vst.msk [vmem:[%s1184_s22 + $0x98] sm:$0xff] %vm236_vm0, %v641_v15 }
 0x158   : > { %v483_v20 = vpop.f32.mrb[8].mxu0  ;;  %v563_v21 = vpop.f32.mrb[8].mxu1 }
 0x159   : > { %v626_v22 = vadd.f32 %v483_v20, %v273_v18  ;;  %v642_v23 = vadd.f32 %v563_v21, %v289_v19  ;;  %v485_v24 = vpop.f32.mrb[9].mxu0  ;;  %v565_v25 = vpop.f32.mrb[9].mxu1  ;;  %v281_v18 = vld [vmem:[%s1184_s22 + $0x60] sm:$0xff] }
 0x15a   : > { %v297_v19 = vld [vmem:[%s1184_s22 + $0xe0] sm:$0xff] }
 0x15b   : > { %659 = vst.msk [vmem:[%s1184_s22 + $0x20] sm:$0xff] %vm236_vm0, %v626_v22  ;;  %675 = vst.msk [vmem:[%s1184_s22 + $0xa0] sm:$0xff] %vm236_vm0, %v642_v23 }
 0x15c   : > { %v488_v28 = vpop.f32.mrb[10].mxu0  ;;  %v568_v29 = vpop.f32.mrb[10].mxu1 }
 0x15d   : > { %v627_v30 = vadd.f32 %v488_v28, %v274_v26  ;;  %v643_v31 = vadd.f32 %v568_v29, %v290_v27  ;;  %v490_v32 = vpop.f32.mrb[11].mxu0  ;;  %v570_v33 = vpop.f32.mrb[11].mxu1  ;;  %v282_v26 = vld [vmem:[%s1184_s22 + $0x68] sm:$0xff] }
 0x15e   : > { %v298_v27 = vld [vmem:[%s1184_s22 + $0xe8] sm:$0xff] }
 0x15f   : > { %660 = vst.msk [vmem:[%s1184_s22 + $0x28] sm:$0xff] %vm236_vm0, %v627_v30  ;;  %676 = vst.msk [vmem:[%s1184_s22 + $0xa8] sm:$0xff] %vm236_vm0, %v643_v31 }
 0x160   : > { %v493_v36 = vpop.f32.mrb[12].mxu0  ;;  %v573_v37 = vpop.f32.mrb[12].mxu1 }
 0x161   : > { %v628_v38 = vadd.f32 %v493_v36, %v275_v34  ;;  %v644_v39 = vadd.f32 %v573_v37, %v291_v35  ;;  %v495_v40 = vpop.f32.mrb[13].mxu0  ;;  %v575_v41 = vpop.f32.mrb[13].mxu1  ;;  %v283_v34 = vld [vmem:[%s1184_s22 + $0x70] sm:$0xff] }
 0x162   : > { %v299_v35 = vld [vmem:[%s1184_s22 + $0xf0] sm:$0xff] }
 0x163   : > { %661 = vst.msk [vmem:[%s1184_s22 + $0x30] sm:$0xff] %vm236_vm0, %v628_v38  ;;  %677 = vst.msk [vmem:[%s1184_s22 + $0xb0] sm:$0xff] %vm236_vm0, %v644_v39 }
 0x164   : > { %v498_v44 = vpop.f32.mrb[14].mxu0  ;;  %v578_v45 = vpop.f32.mrb[14].mxu1 }
 0x165   : > { %v629_v46 = vadd.f32 %v498_v44, %v276_v42  ;;  %v645_v47 = vadd.f32 %v578_v45, %v292_v43  ;;  %v500_v48 = vpop.f32.mrb[15].mxu0  ;;  %v580_v49 = vpop.f32.mrb[15].mxu1  ;;  %v284_v42 = vld [vmem:[%s1184_s22 + $0x78] sm:$0xff] }
 0x166   : > { %v300_v43 = vld [vmem:[%s1184_s22 + $0xf8] sm:$0xff] }
 0x167   : > { %662 = vst.msk [vmem:[%s1184_s22 + $0x38] sm:$0xff] %vm236_vm0, %v629_v46  ;;  %678 = vst.msk [vmem:[%s1184_s22 + $0xb8] sm:$0xff] %vm236_vm0, %v645_v47 }
 0x168   : > { %v503_v52 = vpop.f32.mrb[16].mxu0  ;;  %v583_v53 = vpop.f32.mrb[16].mxu1 }
 0x169   : > { %v630_v54 = vadd.f32 %v503_v52, %v277_v50  ;;  %v646_v55 = vadd.f32 %v583_v53, %v293_v51  ;;  %v505_v56 = vpop.f32.mrb[17].mxu0  ;;  %v585_v57 = vpop.f32.mrb[17].mxu1 }
 0x16b   : > { %663 = vst.msk [vmem:[%s1184_s22 + $0x40] sm:$0xff] %vm236_vm0, %v630_v54  ;;  %679 = vst.msk [vmem:[%s1184_s22 + $0xc0] sm:$0xff] %vm236_vm0, %v646_v55 }
 0x16c   : > { %v508_v60 = vpop.f32.mrb[18].mxu0  ;;  %v588_v61 = vpop.f32.mrb[18].mxu1 }
 0x16d   : > { %v631_v62 = vadd.f32 %v508_v60, %v278_v58  ;;  %v647_v63 = vadd.f32 %v588_v61, %v294_v59  ;;  %v510_v0 = vpop.f32.mrb[19].mxu0  ;;  %v590_v1 = vpop.f32.mrb[19].mxu1 }
 0x16f   : > { %664 = vst.msk [vmem:[%s1184_s22 + $0x48] sm:$0xff] %vm236_vm0, %v631_v62  ;;  %680 = vst.msk [vmem:[%s1184_s22 + $0xc8] sm:$0xff] %vm236_vm0, %v647_v63 }
 0x170   : > { %v513_v4 = vpop.f32.mrb[20].mxu0  ;;  %v593_v5 = vpop.f32.mrb[20].mxu1 }
 0x171   : > { %v632_v6 = vadd.f32 %v513_v4, %v279_v2  ;;  %v648_v7 = vadd.f32 %v593_v5, %v295_v3  ;;  %v515_v8 = vpop.f32.mrb[21].mxu0  ;;  %v595_v9 = vpop.f32.mrb[21].mxu1 }
 0x173   : > { %665 = vst.msk [vmem:[%s1184_s22 + $0x50] sm:$0xff] %vm236_vm0, %v632_v6  ;;  %681 = vst.msk [vmem:[%s1184_s22 + $0xd0] sm:$0xff] %vm236_vm0, %v648_v7 }
 0x174   : > { %v518_v12 = vpop.f32.mrb[22].mxu0  ;;  %v598_v13 = vpop.f32.mrb[22].mxu1 }
 0x175   : > { %v633_v14 = vadd.f32 %v518_v12, %v280_v10  ;;  %v649_v15 = vadd.f32 %v598_v13, %v296_v11  ;;  %v520_v16 = vpop.f32.mrb[23].mxu0  ;;  %v600_v17 = vpop.f32.mrb[23].mxu1 }
 0x177   : > { %666 = vst.msk [vmem:[%s1184_s22 + $0x58] sm:$0xff] %vm236_vm0, %v633_v14  ;;  %682 = vst.msk [vmem:[%s1184_s22 + $0xd8] sm:$0xff] %vm236_vm0, %v649_v15 }
 0x178   : > { %v523_v20 = vpop.f32.mrb[24].mxu0  ;;  %v603_v21 = vpop.f32.mrb[24].mxu1 }
 0x179   : > { %v634_v22 = vadd.f32 %v523_v20, %v281_v18  ;;  %v650_v23 = vadd.f32 %v603_v21, %v297_v19  ;;  %v525_v24 = vpop.f32.mrb[25].mxu0  ;;  %v605_v25 = vpop.f32.mrb[25].mxu1 }
 0x17b   : > { %667 = vst.msk [vmem:[%s1184_s22 + $0x60] sm:$0xff] %vm236_vm0, %v634_v22  ;;  %683 = vst.msk [vmem:[%s1184_s22 + $0xe0] sm:$0xff] %vm236_vm0, %v650_v23 }
 0x17c   : > { %v528_v28 = vpop.f32.mrb[26].mxu0  ;;  %v608_v29 = vpop.f32.mrb[26].mxu1 }
 0x17d   : > { %v635_v30 = vadd.f32 %v528_v28, %v282_v26  ;;  %v651_v31 = vadd.f32 %v608_v29, %v298_v27  ;;  %v530_v32 = vpop.f32.mrb[27].mxu0  ;;  %v610_v33 = vpop.f32.mrb[27].mxu1 }
 0x17f   : > { %668 = vst.msk [vmem:[%s1184_s22 + $0x68] sm:$0xff] %vm236_vm0, %v635_v30  ;;  %684 = vst.msk [vmem:[%s1184_s22 + $0xe8] sm:$0xff] %vm236_vm0, %v651_v31 }
 0x180   : > { %v533_v36 = vpop.f32.mrb[28].mxu0  ;;  %v613_v37 = vpop.f32.mrb[28].mxu1 }
 0x181   : > { %v636_v38 = vadd.f32 %v533_v36, %v283_v34  ;;  %v652_v39 = vadd.f32 %v613_v37, %v299_v35  ;;  %v535_v40 = vpop.f32.mrb[29].mxu0  ;;  %v615_v41 = vpop.f32.mrb[29].mxu1 }
 0x183   : > { %669 = vst.msk [vmem:[%s1184_s22 + $0x70] sm:$0xff] %vm236_vm0, %v636_v38  ;;  %685 = vst.msk [vmem:[%s1184_s22 + $0xf0] sm:$0xff] %vm236_vm0, %v652_v39 }
 0x184   : > { %v538_v44 = vpop.f32.mrb[30].mxu0  ;;  %v618_v45 = vpop.f32.mrb[30].mxu1 }
 0x185   : > { %v637_v46 = vadd.f32 %v538_v44, %v284_v42  ;;  %v653_v47 = vadd.f32 %v618_v45, %v300_v43  ;;  %v540_v48 = vpop.f32.mrb[31].mxu0  ;;  %v620_v49 = vpop.f32.mrb[31].mxu1 }
 0x187   : > { %670 = vst.msk [vmem:[%s1184_s22 + $0x78] sm:$0xff] %vm236_vm0, %v637_v46  ;;  %686 = vst.msk [vmem:[%s1184_s22 + $0xf8] sm:$0xff] %vm236_vm0, %v653_v47 }
 0x188 PF: > { %s15_s14 = sadd.s32 1, %s1033_s14   ;;  %s1540_s9 = smov %s1017_s10 }
 0x189   : > { %p12_p7 = scmp.ge.s32.totalorder %s15_s14, 18   ;;  %s1541_s10 = smov %s1021_s11 }
 0x18a   : > { %s1542_s11 = smov %s1104_s21  ;;  %s1543_s12 = smov %s1029_s13 }
 0x18b   : > { %s1544_s13 = smov %s1546_s16  ;;  %14 = sbr.rel (!%p12_p7) target bundleno = 4 (0x4), region = 75 }
 0x192   :  { %715 = vsyncpa [#allocation3], 1 }
 0x193   :  { %717 = vsyncpa [#allocation3 + $0x1], 1 }

</bundles_post_ra>
